<compile_context>
chip_gen: v7x
topology: tpu7x:2x2x1
jax: 0.10.0
libtpu: 0.0.40
codegen_flags: <defaults>
</compile_context>

<pallas_src>
import functools

import jax
import jax.numpy as jnp
from jax.experimental import pallas as pl
from jax.experimental.pallas import tpu as pltpu

LANES = 128
MAX_TILE_ROWS = 1024  # 1024 * 128 * 4B = 512 KiB per f32 input block


def _sublane_multiple(dtype) -> int:
    # f32 -> 8, bf16 -> 16, int8/bool -> 32 (packed-tile sublane requirement)
    return 8 * max(1, 4 // jnp.dtype(dtype).itemsize)


def _partial_sums_kernel(x_ref, t_ref, m_ref,
                         o_bce, o_inter, o_p, o_t,
                         *, block_rows, n_valid, need_mask):
    x = x_ref[...].astype(jnp.float32)
    t = t_ref[...].astype(jnp.float32)
    m = m_ref[...].astype(jnp.float32)

    if need_mask:
        # Global flat element index of every lane in this tile; elements at or past
        # n_valid (wrapper padding or partial-last-block overrun) contribute 0.
        base = pl.program_id(0) * (block_rows * LANES)
        row = jax.lax.broadcasted_iota(jnp.int32, (block_rows, LANES), 0)
        lane = jax.lax.broadcasted_iota(jnp.int32, (block_rows, LANES), 1)
        valid = (base + row * LANES + lane) < n_valid

    # One EUP exp shared by softplus and sigmoid.
    e = jnp.exp(-jnp.abs(x))
    # Numerically stable softplus(-x) = max(-x, 0) + log1p(exp(-|x|))
    softplus_neg_x = jnp.maximum(-x, 0.0) + jnp.log1p(e)

    # BCEWithLogits with pos_weight = m:
    #   (1 - t) * x + (1 + (m - 1) * t) * softplus(-x)
    bce = (1.0 - t) * x + (1.0 + (m - 1.0) * t) * softplus_neg_x

    # sigmoid(x) = where(x >= 0, 1, e) / (1 + e), e = exp(-|x|)
    denom = 1.0 + e
    inv = pl.reciprocal(denom, approx=True)
    inv = inv * (2.0 - denom * inv)          # one Newton step -> ~f32 accuracy
    p = jnp.where(x >= 0.0, 1.0, e) * inv

    pm = p * m
    tm = t * m
    inter = pm * tm                          # (p*m) * (t*m) = p*t*m^2

    if need_mask:
        # Select (not multiply): also neutralizes NaN/Inf garbage from OOB reads.
        bce = jnp.where(valid, bce, 0.0)
        inter = jnp.where(valid, inter, 0.0)
        pm = jnp.where(valid, pm, 0.0)
        tm = jnp.where(valid, tm, 0.0)

    def rowsum(v):
        # (block_rows, 128) -> (block_rows//8, 8, 128), sum leading axis: pure VPU
        # vreg adds (no XLU cross-lane reduction, no tile-boundary crossing).
        return jnp.reshape(v, (block_rows // 8, 8, LANES)).sum(axis=0)

    o_bce[0] = rowsum(bce)
    o_inter[0] = rowsum(inter)
    o_p[0] = rowsum(pm)
    o_t[0] = rowsum(tm)


@functools.partial(jax.jit, static_argnames=("eps",))
def masked_dice_bce_loss(logits, targets, maskmats, eps=1e-8):
    assert logits.shape == targets.shape == maskmats.shape
    n_elems = logits.size

    def prep(a):
        if a.dtype == jnp.bool_:
            a = a.astype(jnp.int8)
        return jnp.reshape(a, (-1,))

    xf, tf, mf = prep(logits), prep(targets), prep(maskmats)

    row_align = max(_sublane_multiple(a.dtype) for a in (xf, tf, mf))
    elem_align = row_align * LANES
    pad = (-n_elems) % elem_align
    if pad:  # rare; pad values are irrelevant (masked in-kernel)
        xf = jnp.concatenate([xf, jnp.zeros((pad,), xf.dtype)])
        tf = jnp.concatenate([tf, jnp.zeros((pad,), tf.dtype)])
        mf = jnp.concatenate([mf, jnp.zeros((pad,), mf.dtype)])

    rows = (n_elems + pad) // LANES
    block_rows = min(MAX_TILE_ROWS, rows)
    n_blocks = -(-rows // block_rows)
    need_mask = (pad != 0) or (rows % block_rows != 0)

    x2 = jnp.reshape(xf, (rows, LANES))
    t2 = jnp.reshape(tf, (rows, LANES))
    m2 = jnp.reshape(mf, (rows, LANES))

    in_spec = pl.BlockSpec((block_rows, LANES), lambda i: (i, 0))
    out_spec = pl.BlockSpec((1, 8, LANES), lambda i: (i, 0, 0))
    out_sds = jax.ShapeDtypeStruct((n_blocks, 8, LANES), jnp.float32)

    kernel = functools.partial(
        _partial_sums_kernel,
        block_rows=block_rows,
        n_valid=n_elems,
        need_mask=need_mask,
    )

    p_bce, p_inter, p_p, p_t = pl.pallas_call(
        kernel,
        out_shape=(out_sds, out_sds, out_sds, out_sds),
        grid_spec=pltpu.PrefetchScalarGridSpec(
            num_scalar_prefetch=0,
            grid=(n_blocks,),
            in_specs=[in_spec, in_spec, in_spec],
            out_specs=(out_spec, out_spec, out_spec, out_spec),
        ),
        compiler_params=pltpu.CompilerParams(
            dimension_semantics=("parallel",)),
    )(x2, t2, m2)

    # Tiny final reductions (n_blocks * 4 KiB) done in plain JAX.
    sum_bce = jnp.sum(p_bce)
    sum_inter = jnp.sum(p_inter)
    sum_p = jnp.sum(p_p)
    sum_t = jnp.sum(p_t)

    bce_loss = sum_bce / jnp.float32(n_elems)
    dice_score = (2.0 * sum_inter + eps) / (sum_p + sum_t + eps)
    return bce_loss + (1.0 - dice_score)


def _reference(logits, targets, maskmats, eps=1e-8):
    x = logits.astype(jnp.float32)
    t = targets.astype(jnp.float32)
    m = maskmats.astype(jnp.float32)
    sp = jnp.maximum(-x, 0.0) + jnp.log1p(jnp.exp(-jnp.abs(x)))
    bce = jnp.mean((1.0 - t) * x + (1.0 + (m - 1.0) * t) * sp)
    p = jax.nn.sigmoid(x)
    inter = 2.0 * jnp.sum((p * m) * (t * m))
    union = jnp.sum(p * m) + jnp.sum(t * m)
    dice = 1.0 - (inter + eps) / (union + eps)
    return bce + dice


if __name__ == "__main__":
    key = jax.random.PRNGKey(0)

    cases = [
        ((2, 2, 4, 16, 16), jnp.float32),    # aligned: zero-copy, single block
        ((2, 3, 5, 24, 20), jnp.float32),    # unaligned: pad + in-kernel tail mask
        ((1, 2, 9, 128, 72), jnp.bfloat16),  # bf16 logits, multi-block grid + overrun mask
    ]

    for idx, (shape, ldt) in enumerate(cases):
        k1, k2, k3 = jax.random.split(jax.random.fold_in(key, idx), 3)
        logits = jax.random.normal(k1, shape, dtype=jnp.float32).astype(ldt)
        targets = (jax.random.uniform(k2, shape) > 0.5).astype(jnp.float32)
        maskmats = (jax.random.uniform(k3, shape) > 0.3).astype(jnp.float32)

        out = jax.block_until_ready(masked_dice_bce_loss(logits, targets, maskmats))
        ref = _reference(logits, targets, maskmats)
        assert jnp.allclose(out, ref, rtol=1e-4, atol=1e-4), (shape, out, ref)

    print("KERNEL_OK")
</pallas_src>

<mosaic_0001>
module attributes {stable_mosaic.version = 11 : i64} {
  func.func @_partial_sums_kernel(%arg0: i32, %arg1: memref<32x128xf32, #tpu.memory_space<vmem>>, %arg2: memref<32x128xf32, #tpu.memory_space<vmem>>, %arg3: memref<32x128xf32, #tpu.memory_space<vmem>>, %arg4: memref<1x8x128xf32, #tpu.memory_space<vmem>>, %arg5: memref<1x8x128xf32, #tpu.memory_space<vmem>>, %arg6: memref<1x8x128xf32, #tpu.memory_space<vmem>>, %arg7: memref<1x8x128xf32, #tpu.memory_space<vmem>>) attributes {dimension_semantics = [#tpu.dimension_semantics<parallel>], iteration_bounds = array<i64: 1>, scalar_prefetch = 0 : i64, scratch_operands = 0 : i64, tpu.core_type = #tpu.core_type<tc>, window_params = [{transform_indices = @transform_0, window_bounds = array<i64: 32, 128>}, {transform_indices = @transform_1, window_bounds = array<i64: 32, 128>}, {transform_indices = @transform_2, window_bounds = array<i64: 32, 128>}, {transform_indices = @transform_3, window_bounds = array<i64: 1, 8, 128>}, {transform_indices = @transform_4, window_bounds = array<i64: 1, 8, 128>}, {transform_indices = @transform_5, window_bounds = array<i64: 1, 8, 128>}, {transform_indices = @transform_6, window_bounds = array<i64: 1, 8, 128>}]} {
    %c0 = arith.constant 0 : index
    %c0_0 = arith.constant 0 : index
    %0 = vector.load %arg1[%c0, %c0_0] : memref<32x128xf32, #tpu.memory_space<vmem>>, vector<32x128xf32>
    %c0_1 = arith.constant 0 : index
    %c0_2 = arith.constant 0 : index
    %1 = vector.load %arg2[%c0_1, %c0_2] : memref<32x128xf32, #tpu.memory_space<vmem>>, vector<32x128xf32>
    %c0_3 = arith.constant 0 : index
    %c0_4 = arith.constant 0 : index
    %2 = vector.load %arg3[%c0_3, %c0_4] : memref<32x128xf32, #tpu.memory_space<vmem>>, vector<32x128xf32>
    %3 = math.absf %0 : vector<32x128xf32>
    %cst = arith.constant 0.000000e+00 : f32
    %4 = vector.broadcast %cst : f32 to vector<32x128xf32>
    %5 = arith.subf %4, %3 : vector<32x128xf32>
    %6 = math.exp %5 : vector<32x128xf32>
    %cst_5 = arith.constant 0.000000e+00 : f32
    %7 = vector.broadcast %cst_5 : f32 to vector<32x128xf32>
    %8 = arith.subf %7, %0 : vector<32x128xf32>
    %cst_6 = arith.constant 0.000000e+00 : f32
    %9 = vector.broadcast %cst_6 : f32 to vector<32x128xf32>
    %10 = arith.maximumf %8, %9 : vector<32x128xf32>
    %11 = math.log1p %6 : vector<32x128xf32>
    %12 = arith.addf %10, %11 : vector<32x128xf32>
    %cst_7 = arith.constant 1.000000e+00 : f32
    %13 = vector.broadcast %cst_7 : f32 to vector<32x128xf32>
    %14 = arith.subf %13, %1 : vector<32x128xf32>
    %15 = arith.mulf %14, %0 : vector<32x128xf32>
    %cst_8 = arith.constant 1.000000e+00 : f32
    %16 = vector.broadcast %cst_8 : f32 to vector<32x128xf32>
    %17 = arith.subf %2, %16 : vector<32x128xf32>
    %18 = arith.mulf %17, %1 : vector<32x128xf32>
    %cst_9 = arith.constant 1.000000e+00 : f32
    %19 = vector.broadcast %cst_9 : f32 to vector<32x128xf32>
    %20 = arith.addf %19, %18 : vector<32x128xf32>
    %21 = arith.mulf %20, %12 : vector<32x128xf32>
    %22 = arith.addf %15, %21 : vector<32x128xf32>
    %cst_10 = arith.constant 1.000000e+00 : f32
    %23 = vector.broadcast %cst_10 : f32 to vector<32x128xf32>
    %24 = arith.addf %23, %6 : vector<32x128xf32>
    %25 = tpu.reciprocal %24 {approx = true} : vector<32x128xf32> -> vector<32x128xf32>
    %26 = arith.mulf %24, %25 : vector<32x128xf32>
    %cst_11 = arith.constant 2.000000e+00 : f32
    %27 = vector.broadcast %cst_11 : f32 to vector<32x128xf32>
    %28 = arith.subf %27, %26 : vector<32x128xf32>
    %29 = arith.mulf %25, %28 : vector<32x128xf32>
    %cst_12 = arith.constant 0.000000e+00 : f32
    %30 = vector.broadcast %cst_12 : f32 to vector<32x128xf32>
    %31 = arith.cmpf oge, %0, %30 : vector<32x128xf32>
    %cst_13 = arith.constant 1.000000e+00 : f32
    %32 = vector.broadcast %cst_13 : f32 to vector<32x128xf32>
    %33 = arith.select %31, %32, %6 : vector<32x128xi1>, vector<32x128xf32>
    %34 = arith.mulf %33, %29 : vector<32x128xf32>
    %35 = arith.mulf %34, %2 : vector<32x128xf32>
    %36 = arith.mulf %1, %2 : vector<32x128xf32>
    %37 = arith.mulf %35, %36 : vector<32x128xf32>
    %38 = vector.shape_cast %22 : vector<32x128xf32> to vector<4x8x128xf32>
    %cst_14 = arith.constant dense<0.000000e+00> : vector<8x128xf32>
    %39 = vector.multi_reduction <add>, %38, %cst_14 [0] : vector<4x8x128xf32> to vector<8x128xf32>
    %c0_15 = arith.constant 0 : index
    %c0_16 = arith.constant 0 : index
    %c0_17 = arith.constant 0 : index
    %40 = vector.load %arg4[%c0_15, %c0_16, %c0_17] : memref<1x8x128xf32, #tpu.memory_space<vmem>>, vector<1x8x128xf32>
    %41 = vector.shape_cast %40 : vector<1x8x128xf32> to vector<8x128xf32>
    %42 = vector.shape_cast %39 : vector<8x128xf32> to vector<1x8x128xf32>
    tpu.vector_store %arg4[%c0_15, %c0_16, %c0_17], %42 {strides = array<i32>} : memref<1x8x128xf32, #tpu.memory_space<vmem>>, vector<1x8x128xf32>,
    %43 = vector.shape_cast %37 : vector<32x128xf32> to vector<4x8x128xf32>
    %cst_18 = arith.constant dense<0.000000e+00> : vector<8x128xf32>
    %44 = vector.multi_reduction <add>, %43, %cst_18 [0] : vector<4x8x128xf32> to vector<8x128xf32>
    %c0_19 = arith.constant 0 : index
    %c0_20 = arith.constant 0 : index
    %c0_21 = arith.constant 0 : index
    %45 = vector.load %arg5[%c0_19, %c0_20, %c0_21] : memref<1x8x128xf32, #tpu.memory_space<vmem>>, vector<1x8x128xf32>
    %46 = vector.shape_cast %45 : vector<1x8x128xf32> to vector<8x128xf32>
    %47 = vector.shape_cast %44 : vector<8x128xf32> to vector<1x8x128xf32>
    tpu.vector_store %arg5[%c0_19, %c0_20, %c0_21], %47 {strides = array<i32>} : memref<1x8x128xf32, #tpu.memory_space<vmem>>, vector<1x8x128xf32>,
    %48 = vector.shape_cast %35 : vector<32x128xf32> to vector<4x8x128xf32>
    %cst_22 = arith.constant dense<0.000000e+00> : vector<8x128xf32>
    %49 = vector.multi_reduction <add>, %48, %cst_22 [0] : vector<4x8x128xf32> to vector<8x128xf32>
    %c0_23 = arith.constant 0 : index
    %c0_24 = arith.constant 0 : index
    %c0_25 = arith.constant 0 : index
    %50 = vector.load %arg6[%c0_23, %c0_24, %c0_25] : memref<1x8x128xf32, #tpu.memory_space<vmem>>, vector<1x8x128xf32>
    %51 = vector.shape_cast %50 : vector<1x8x128xf32> to vector<8x128xf32>
    %52 = vector.shape_cast %49 : vector<8x128xf32> to vector<1x8x128xf32>
    tpu.vector_store %arg6[%c0_23, %c0_24, %c0_25], %52 {strides = array<i32>} : memref<1x8x128xf32, #tpu.memory_space<vmem>>, vector<1x8x128xf32>,
    %53 = vector.shape_cast %36 : vector<32x128xf32> to vector<4x8x128xf32>
    %cst_26 = arith.constant dense<0.000000e+00> : vector<8x128xf32>
    %54 = vector.multi_reduction <add>, %53, %cst_26 [0] : vector<4x8x128xf32> to vector<8x128xf32>
    %c0_27 = arith.constant 0 : index
    %c0_28 = arith.constant 0 : index
    %c0_29 = arith.constant 0 : index
    %55 = vector.load %arg7[%c0_27, %c0_28, %c0_29] : memref<1x8x128xf32, #tpu.memory_space<vmem>>, vector<1x8x128xf32>
    %56 = vector.shape_cast %55 : vector<1x8x128xf32> to vector<8x128xf32>
    %57 = vector.shape_cast %54 : vector<8x128xf32> to vector<1x8x128xf32>
    tpu.vector_store %arg7[%c0_27, %c0_28, %c0_29], %57 {strides = array<i32>} : memref<1x8x128xf32, #tpu.memory_space<vmem>>, vector<1x8x128xf32>,
    return
  }
  func.func @transform_0(%arg0: i32) -> (i32, i32) {
    %c0_i32 = arith.constant 0 : i32
    %c0_i32_0 = arith.constant 0 : i32
    return %arg0, %c0_i32 : i32, i32
  }
  func.func @transform_1(%arg0: i32) -> (i32, i32) {
    %c0_i32 = arith.constant 0 : i32
    %c0_i32_0 = arith.constant 0 : i32
    return %arg0, %c0_i32 : i32, i32
  }
  func.func @transform_2(%arg0: i32) -> (i32, i32) {
    %c0_i32 = arith.constant 0 : i32
    %c0_i32_0 = arith.constant 0 : i32
    return %arg0, %c0_i32 : i32, i32
  }
  func.func @transform_3(%arg0: i32) -> (i32, i32, i32) {
    %c0_i32 = arith.constant 0 : i32
    %c0_i32_0 = arith.constant 0 : i32
    %c0_i32_1 = arith.constant 0 : i32
    return %arg0, %c0_i32, %c0_i32_0 : i32, i32, i32
  }
  func.func @transform_4(%arg0: i32) -> (i32, i32, i32) {
    %c0_i32 = arith.constant 0 : i32
    %c0_i32_0 = arith.constant 0 : i32
    %c0_i32_1 = arith.constant 0 : i32
    return %arg0, %c0_i32, %c0_i32_0 : i32, i32, i32
  }
  func.func @transform_5(%arg0: i32) -> (i32, i32, i32) {
    %c0_i32 = arith.constant 0 : i32
    %c0_i32_0 = arith.constant 0 : i32
    %c0_i32_1 = arith.constant 0 : i32
    return %arg0, %c0_i32, %c0_i32_0 : i32, i32, i32
  }
  func.func @transform_6(%arg0: i32) -> (i32, i32, i32) {
    %c0_i32 = arith.constant 0 : i32
    %c0_i32_0 = arith.constant 0 : i32
    %c0_i32_1 = arith.constant 0 : i32
    return %arg0, %c0_i32, %c0_i32_0 : i32, i32, i32
  }
}

</mosaic_0001>

<bundles_post_ra>
// kernel: masked_dice_bce_loss.1
= control target key start
LH: loop header
LB: loop body
LE: loop exit
PB: predicated region body
PF: predicated region fallthrough
CT: control target
= control target key end

     0   :  { %s478_s0 = inlined_call_operand.vmem [shape: f32[32,128], index: 0, kind: input, shape index: {}]   ;;  %s479_s1 = inlined_call_operand.vmem [shape: f32[32,128], index: 1, kind: input, shape index: {}]   ;;  %s480_s2 = inlined_call_operand.vmem [shape: f32[32,128], index: 2, kind: input, shape index: {}]   ;;  %s481_s6 = inlined_call_operand.vmem [shape: f32[1,8,128], index: 6, kind: output, shape index: {3}]   ;;  %s482_s3 = inlined_call_operand.vmem [shape: f32[1,8,128], index: 3, kind: output, shape index: {0}]   ;;  %s483_s5 = inlined_call_operand.vmem [shape: f32[1,8,128], index: 5, kind: output, shape index: {2}]   ;;  %s484_s4 = inlined_call_operand.vmem [shape: f32[1,8,128], index: 4, kind: output, shape index: {1}]  }
   0x1   :  { %v264_v0 = vld [vmem:[%s478_s0] sm:$0xff]  ;;  %v269_v1 = vld [vmem:[%s478_s0 + $0x8] sm:$0xff]  ;;  %v274_v2 = vld [vmem:[%s478_s0 + $0x10] sm:$0xff] }
   0x2   :  { %v279_v3 = vld [vmem:[%s478_s0 + $0x18] sm:$0xff]  ;;  %v30_v4 = vand.u32 2147483647, %v264_v0  ;;  %v31_v5 = vand.u32 2147483647, %v269_v1  ;;  %v22_v16 = vld [vmem:[%s479_s1] sm:$0xff] }
   0x3   :  { %v32_v6 = vand.u32 2147483647, %v274_v2  ;;  %v33_v8 = vand.u32 2147483647, %v279_v3  ;;  %v46_v17 = vsub.f32 0.0, %v264_v0  ;;  %v47_v18 = vsub.f32 0.0, %v269_v1 }
   0x4   :  { %v34_v7 = vsub.f32 0.0, %v30_v4  ;;  %v35_v9 = vsub.f32 0.0, %v31_v5  ;;  %v23_v19 = vld [vmem:[%s479_s1 + $0x8] sm:$0xff]  ;;  %v296_v20 = vld [vmem:[%s480_s2] sm:$0xff]  ;;  %v48_v22 = vsub.f32 0.0, %v274_v2  ;;  %v49_v23 = vsub.f32 0.0, %v279_v3 }
   0x5   :  { %v36_v10 = vsub.f32 0.0, %v32_v6  ;;  %v37_v12 = vsub.f32 0.0, %v33_v8  ;;  %v301_v21 = vld [vmem:[%s480_s2 + $0x8] sm:$0xff]  ;;  %v306_v24 = vmul.f32 %v296_v20, %v22_v16  ;;  %v94_v27 = vsub.f32 1.0, %v22_v16  ;;  %v24_v30 = vld [vmem:[%s479_s1 + $0x10] sm:$0xff]  ;;  %v321_v31 = vld [vmem:[%s479_s1 + $0x18] sm:$0xff] }
   0x6   :  { %v38_v11 = vmul.f32 1.442695, %v34_v7  ;;  %v40_v13 = vmul.f32 1.442695, %v35_v9  ;;  %v309_v25 = vmul.f32 %v301_v21, %v23_v19  ;;  %v95_v28 = vsub.f32 1.0, %v23_v19  ;;  %v337_v37 = vld [vmem:[%s480_s2 + $0x10] sm:$0xff] }
   0x7   :  { %v42_v14 = vmul.f32 1.442695, %v36_v10  ;;  %v44_v15 = vmul.f32 1.442695, %v37_v12  ;;  %v323_v32 = vmax.f32 %v46_v17, 0.0  ;;  %v325_v33 = vmax.f32 %v47_v18, 0.0 }
   0x8   :  { %202 = vpow2.f32 %v38_v11  ;;  %v178_v35 = vadd.f32 %v309_v25, %v306_v24  ;;  %v339_v38 = vmax.f32 %v48_v22, 0.0  ;;  %v96_v40 = vsub.f32 1.0, %v24_v30  ;;  %v367_v49 = vld [vmem:[%s480_s2 + $0x18] sm:$0xff] }
   0x9   :  { %204 = vpow2.f32 %v40_v13  ;;  %v97_v41 = vsub.f32 1.0, %v321_v31  ;;  %v347_v43 = vmax.f32 %v49_v23, 0.0  ;;  %v354_v45 = vmul.f32 %v337_v37, %v24_v30 }
   0xa   :  { %206 = vpow2.f32 %v42_v14  ;;  %v359_v47 = vmul.f32 %v94_v27, %v264_v0  ;;  %v362_v48 = vmul.f32 %v95_v28, %v269_v1  ;;  %v377_v54 = vmul.f32 %v96_v40, %v274_v2 }
   0xb   :  { %208 = vpow2.f32 %v44_v15  ;;  %v179_v52 = vadd.f32 %v178_v35, %v354_v45  ;;  %v380_v55 = vmul.f32 %v97_v41, %v279_v3  ;;  %v198_v56 = vadd.f32 -1.0, %v296_v20 }
   0xc   :  { %v199_v57 = vadd.f32 -1.0, %v301_v21  ;;  %v200_v58 = vadd.f32 -1.0, %v337_v37  ;;  %v388_v59 = vmul.f32 %v367_v49, %v321_v31  ;;  %v201_v62 = vadd.f32 -1.0, %v367_v49 }
   0xd   :  { %v106_v8 = vmul.f32 %v198_v56, %v22_v16  ;;  %vm142_vm0 = vcmp.ge.f32.partialorder %v264_v0, 0.0  ;;  %vm143_vm1 = vcmp.ge.f32.partialorder %v269_v1, 0.0  ;;  %vm144_vm2 = vcmp.ge.f32.partialorder %v274_v2, 0.0 }
   0xe   :  { %v180_v5 = vadd.f32 %v179_v52, %v388_v59  ;;  %v107_v10 = vmul.f32 %v199_v57, %v23_v19  ;;  %v108_v17 = vmul.f32 %v200_v58, %v24_v30  ;;  %v109_v27 = vmul.f32 %v201_v62, %v321_v31 }
   0xf   :  { %v110_v41 = vadd.f32 1.0, %v106_v8  ;;  %vm145_vm6 = vcmp.ge.f32.partialorder %v279_v3, 0.0 }
  0x10   :  { %181 = vst [vmem:[%s481_s6] sm:$0xff] %v180_v5  ;;  %v111_v52 = vadd.f32 1.0, %v107_v10  ;;  %v112_v58 = vadd.f32 1.0, %v108_v17 }
  0x12   :  { %v311_v26 = vpop.eup %202 }
  0x13   :  { %v313_v29 = vpop.eup %204  ;;  %v328_v34 = vadd.f32 1.0, %v311_v26  ;;  %v57_v46 = vmul.f32 -0.5, %v311_v26  ;;  %v60_v63 = vand.u32 2147483647, %v311_v26 }
  0x14   :  { %v332_v36 = vpop.eup %206  ;;  %v342_v39 = vadd.f32 1.0, %v313_v29  ;;  %v66_v50 = vmul.f32 -0.5, %v313_v29  ;;  %v69_v6 = vand.u32 2147483647, %v313_v29 }
  0x15   :  { %v345_v42 = vpop.eup %208  ;;  %210 = vlog2.f32 %v328_v34  ;;  %v351_v44 = vadd.f32 1.0, %v332_v36  ;;  %v75_v53 = vmul.f32 -0.5, %v332_v36  ;;  %v58_v60 = vadd.f32 1.0, %v57_v46 }
  0x16   :  { %212 = vlog2.f32 %v342_v39  ;;  %v372_v51 = vadd.f32 1.0, %v345_v42  ;;  %v84_v61 = vmul.f32 -0.5, %v345_v42  ;;  %v67_v4 = vadd.f32 1.0, %v66_v50 }
  0x17   :  { %214 = vlog2.f32 %v351_v44  ;;  %v76_v7 = vadd.f32 1.0, %v75_v53  ;;  %v78_v9 = vand.u32 2147483647, %v332_v36  ;;  %v59_v11 = vmul.f32 %v311_v26, %v58_v60 }
  0x18   :  { %216 = vlog2.f32 %v372_v51  ;;  %v85_v12 = vadd.f32 1.0, %v84_v61  ;;  %vm407_vm3 = vcmp.lt.f32.partialorder %v60_v63, 0.0004427343  ;;  %v68_v15 = vmul.f32 %v313_v29, %v67_v4 }
  0x19   :  { %218 = vrcp.f32 %v328_v34  ;;  %v87_v16 = vand.u32 2147483647, %v345_v42  ;;  %vm413_vm4 = vcmp.lt.f32.partialorder %v69_v6, 0.0004427343  ;;  %v77_v23 = vmul.f32 %v332_v36, %v76_v7 }
  0x1a   :  { %220 = vrcp.f32 %v342_v39  ;;  %vm419_vm5 = vcmp.lt.f32.partialorder %v78_v9, 0.0004427343  ;;  %v86_v50 = vmul.f32 %v345_v42, %v85_v12  ;;  %v113_v4 = vadd.f32 1.0, %v109_v27 }
  0x1b   :  { %222 = vrcp.f32 %v351_v44  ;;  %vm429_vm7 = vcmp.lt.f32.partialorder %v87_v16, 0.0004427343  ;;  %v146_v9 = vsel %vm142_vm0, 1.0, %v311_v26  ;;  %v148_v1 = vsel %vm144_vm2, 1.0, %v332_v36 }
  0x1c   :  { %224 = vrcp.f32 %v372_v51 }
  0x1f   :  { %v211_v13 = vpop.eup %210 }
  0x20   :  { %v213_v18 = vpop.eup %212  ;;  %v56_v19 = vmul.f32 0.6931472, %v211_v13 }
  0x21   :  { %v215_v28 = vpop.eup %214  ;;  %v65_v35 = vmul.f32 0.6931472, %v213_v18 }
  0x22   :  { %v62_v30 = vsel %vm407_vm3, %v59_v11, %v56_v19  ;;  %v74_v46 = vmul.f32 0.6931472, %v215_v28  ;;  %v217_v53 = vpop.eup %216 }
  0x23   :  { %v71_v31 = vsel %vm413_vm4, %v68_v15, %v65_v35  ;;  %v90_v57 = vadd.f32 %v62_v30, %v323_v32  ;;  %v219_v60 = vpop.eup %218  ;;  %v83_v62 = vmul.f32 0.6931472, %v217_v53 }
  0x24   :  { %v80_v61 = vsel %vm419_vm5, %v77_v23, %v74_v46  ;;  %v91_v63 = vadd.f32 %v71_v31, %v325_v33  ;;  %v221_v5 = vpop.eup %220  ;;  %v130_v8 = vmul.f32 %v219_v60, %v328_v34  ;;  %v147_v33 = vsel %vm143_vm1, 1.0, %v313_v29 }
  0x25   :  { %v92_v6 = vadd.f32 %v80_v61, %v339_v38  ;;  %v114_v7 = vmul.f32 %v110_v41, %v90_v57  ;;  %v223_v32 = vpop.eup %222  ;;  %v89_v10 = vsel %vm429_vm7, %v86_v50, %v83_v62  ;;  %v131_v12 = vmul.f32 %v221_v5, %v342_v39 }
  0x26   :  { %v115_v11 = vmul.f32 %v111_v52, %v91_v63  ;;  %v225_v13 = vpop.eup %224  ;;  %v93_v38 = vadd.f32 %v89_v10, %v347_v43  ;;  %v132_v0 = vmul.f32 %v223_v32, %v351_v44  ;;  %v134_v16 = vsub.f32 2.0, %v130_v8 }
  0x27   :  { %v116_v14 = vmul.f32 %v112_v58, %v92_v6  ;;  %v118_v34 = vadd.f32 %v114_v7, %v359_v47  ;;  %v133_v15 = vmul.f32 %v225_v13, %v372_v51  ;;  %v135_v17 = vsub.f32 2.0, %v131_v12 }
  0x28   :  { %v119_v26 = vadd.f32 %v115_v11, %v362_v48  ;;  %v117_v18 = vmul.f32 %v113_v4, %v93_v38  ;;  %v136_v19 = vsub.f32 2.0, %v132_v0  ;;  %v138_v22 = vmul.f32 %v219_v60, %v134_v16 }
  0x29   :  { %v120_v39 = vadd.f32 %v116_v14, %v377_v54  ;;  %v137_v43 = vsub.f32 2.0, %v133_v15  ;;  %v139_v47 = vmul.f32 %v221_v5, %v135_v17  ;;  %v149_v48 = vsel %vm145_vm6, 1.0, %v345_v42 }
  0x2a   :  { %v166_v29 = vadd.f32 %v119_v26, %v118_v34  ;;  %v121_v44 = vadd.f32 %v117_v18, %v380_v55  ;;  %v140_v23 = vmul.f32 %v223_v32, %v136_v19  ;;  %v150_v28 = vmul.f32 %v146_v9, %v138_v22 }
  0x2b   :  { %v141_v27 = vmul.f32 %v225_v13, %v137_v43  ;;  %v151_v54 = vmul.f32 %v147_v33, %v139_v47 }
  0x2c   :  { %v167_v51 = vadd.f32 %v166_v29, %v120_v39  ;;  %v152_v35 = vmul.f32 %v148_v1, %v140_v23  ;;  %v154_v2 = vmul.f32 %v150_v28, %v296_v20 }
  0x2d   :  { %v153_v41 = vmul.f32 %v149_v48, %v141_v27  ;;  %v155_v36 = vmul.f32 %v151_v54, %v301_v21 }
  0x2e   :  { %v168_v40 = vadd.f32 %v167_v51, %v121_v44  ;;  %v156_v30 = vmul.f32 %v152_v35, %v337_v37  ;;  %v162_v42 = vmul.f32 %v306_v24, %v154_v2 }
  0x2f   :  { %v157_v3 = vmul.f32 %v153_v41, %v367_v49  ;;  %v163_v55 = vmul.f32 %v309_v25, %v155_v36  ;;  %v174_v46 = vadd.f32 %v155_v36, %v154_v2 }
  0x30   :  { %169 = vst [vmem:[%s482_s3] sm:$0xff] %v168_v40  ;;  %v164_v50 = vmul.f32 %v354_v45, %v156_v30 }
  0x31   :  { %v165_v52 = vmul.f32 %v388_v59, %v157_v3  ;;  %v170_v20 = vadd.f32 %v163_v55, %v162_v42  ;;  %v175_v53 = vadd.f32 %v174_v46, %v156_v30 }
  0x33   :  { %v171_v21 = vadd.f32 %v170_v20, %v164_v50  ;;  %v176_v31 = vadd.f32 %v175_v53, %v157_v3 }
  0x35   :  { %v172_v37 = vadd.f32 %v171_v21, %v165_v52  ;;  %177 = vst [vmem:[%s483_s5] sm:$0xff] %v176_v31 }
  0x37   :  { %173 = vst [vmem:[%s484_s4] sm:$0xff] %v172_v37 }

</bundles_post_ra>
